<compile_context>
chip_gen: v7x
topology: tpu7x:2x2x1
jax: 0.10.0
libtpu: 0.0.40
codegen_flags: <defaults>
</compile_context>

<pallas_src>
import jax
import jax.numpy as jnp
from jax.experimental import pallas as pl
from jax.experimental.pallas import tpu as pltpu


def _round_up(x, m):
    return (x + m - 1) // m * m


def _sublane(dtype):
    """Native sublane packing for a dtype (rows per vreg sublane group)."""
    return {4: 8, 2: 16, 1: 32}.get(jnp.dtype(dtype).itemsize, 8)


def _pick_tile(extent, cap, granularity):
    """Choose (tile, padded_extent) with tile a multiple of `granularity`,
    tile <= cap, and tile dividing padded_extent.

    Prefers exact divisors of the granularity-padded extent (zero extra
    padding); accepts a small amount of extra padding (< ~13% + one tile row)
    only when an exact divisor would force a tile less than half the cap.
    """
    extent = _round_up(extent, granularity)
    cap = max(granularity, min(cap, extent))
    cap = cap // granularity * granularity
    best = granularity
    for t in range(cap, granularity - 1, -granularity):
        if extent % t == 0:
            best = t
            break
    if best * 2 <= cap:
        padded = _round_up(extent, cap)
        if padded - extent <= extent // 8 + granularity:
            return cap, padded
    return best, extent


def _vmem_limit_bytes():
    """Generation-aware scoped-VMEM budget (leave headroom above our ~20 MiB
    worst-case tile footprint, never ask for more than ~5/8 of physical)."""
    physical = 64 * 1024 * 1024  # conservative fallback: v7x per-TC VMEM
    try:
        physical = getattr(
            pltpu.get_tpu_info(), "vmem_capacity_bytes", physical
        )
    except Exception:
        pass
    return min(int(physical * 5 // 8), 80 * 1024 * 1024)


# ----------------------------------------------------------------------------
# Kernels
# ----------------------------------------------------------------------------
def _linear_kernel_f32_out(x_ref, wt_ref, b_ref, o_ref):
    """f32-output path: accumulate directly into the resident output block.

    x_ref  : (tm, tk) LHS tile
    wt_ref : (tk, tn) pre-transposed weight tile (lane-dense D_out)
    b_ref  : (1, tn)  bias tile (resident across the K axis)
    o_ref  : (tm, tn) f32 output tile (resident across the K axis)
    """
    @pl.when(pl.program_id(2) == 0)
    def _():
        # Seed the accumulator with the bias -> bias added exactly once.
        o_ref[...] = jnp.broadcast_to(b_ref[...], o_ref.shape)

    o_ref[...] += jnp.dot(
        x_ref[...], wt_ref[...], preferred_element_type=jnp.float32
    )


def _linear_kernel_acc(x_ref, wt_ref, b_ref, o_ref, acc_ref):
    """Scratch-accumulator path for non-f32 (e.g. bf16) output dtypes."""
    k = pl.program_id(2)

    @pl.when(k == 0)
    def _():
        acc_ref[...] = jnp.broadcast_to(b_ref[...], acc_ref.shape)

    acc_ref[...] += jnp.dot(
        x_ref[...], wt_ref[...], preferred_element_type=jnp.float32
    )

    @pl.when(k == pl.num_programs(2) - 1)
    def _():
        o_ref[...] = acc_ref[...].astype(o_ref.dtype)


# ----------------------------------------------------------------------------
# Wrapper
# ----------------------------------------------------------------------------
def _linear_forward_impl(x, weight, bias, *, force_pallas=False, compute_dtype=None):
    """y = x @ weight.T + bias  (torch.nn.Linear semantics)."""
    B, D_in = x.shape
    D_out = weight.shape[0]
    out_dtype = x.dtype

    # Tiny shapes: launch / padding / DMA overhead dominates -> fused XLA wins.
    if not force_pallas and 2 * B * D_in * D_out < (1 << 21):
        return (x @ weight.T + bias).astype(out_dtype)

    cdtype = jnp.dtype(compute_dtype) if compute_dtype is not None else jnp.dtype(x.dtype)

    # --- tile + padding selection (padding granularity decoupled from tiles) --
    tm, M = _pick_tile(B, 512, _sublane(cdtype))   # sublane dim of x / out
    tn, N = _pick_tile(D_out, 512, 128)            # lane-dense output dim
    tk, K = _pick_tile(D_in, 2048, 128)            # contraction dim

    # Zero-pad (padded K columns contribute 0; padded M rows / N cols sliced off).
    x_p = jnp.pad(x, ((0, M - B), (0, K - D_in))).astype(cdtype)
    w_p = jnp.pad(weight.T, ((0, K - D_in), (0, N - D_out))).astype(cdtype)
    b_p = jnp.pad(bias, (0, N - D_out)).reshape(1, N).astype(jnp.float32)

    grid = (M // tm, N // tn, K // tk)

    in_specs = [
        pl.BlockSpec((tm, tk), lambda i, j, k: (i, k)),   # x
        pl.BlockSpec((tk, tn), lambda i, j, k: (k, j)),   # W^T
        pl.BlockSpec((1, tn), lambda i, j, k: (0, j)),    # bias (resident over k)
    ]
    out_spec = pl.BlockSpec((tm, tn), lambda i, j, k: (i, j))

    if jnp.dtype(out_dtype) == jnp.float32:
        kernel = _linear_kernel_f32_out
        scratch = []                                  # accumulate in o_ref itself
    else:
        kernel = _linear_kernel_acc
        scratch = [pltpu.VMEM((tm, tn), jnp.float32)]

    itemsize = cdtype.itemsize
    cost = pl.CostEstimate(
        flops=2 * M * N * K,
        bytes_accessed=(
            itemsize * (M * K * (N // tn) + K * N * (M // tm))
            + jnp.dtype(out_dtype).itemsize * M * N
        ),
        transcendentals=0,
    )

    out_p = pl.pallas_call(
        kernel,
        out_shape=jax.ShapeDtypeStruct((M, N), out_dtype),
        grid_spec=pltpu.PrefetchScalarGridSpec(
            num_scalar_prefetch=0,
            grid=grid,
            in_specs=in_specs,
            out_specs=out_spec,
            scratch_shapes=scratch,
        ),
        compiler_params=pltpu.CompilerParams(
            dimension_semantics=("parallel", "parallel", "arbitrary"),
            vmem_limit_bytes=_vmem_limit_bytes(),
        ),
        cost_estimate=cost,
    )(x_p, w_p, b_p)

    return out_p[:B, :D_out]


# jit so the per-call weight transpose + padding fuse with the kernel launch
# instead of dispatching as separate full-HBM-pass XLA ops.
linear_forward = jax.jit(
    _linear_forward_impl, static_argnames=("force_pallas", "compute_dtype")
)


if __name__ == "__main__":
    key = jax.random.PRNGKey(0)
    kx, kw, kb, kx2, kw2, kb2 = jax.random.split(key, 6)

    # --- small shapes consistent with the module: LinearRegression(32, 16), batch 8
    batch, input_dim, output_dim = 8, 32, 16
    x = jax.random.normal(kx, (batch, input_dim), dtype=jnp.float32)
    bound = 1.0 / (input_dim ** 0.5)
    weight = jax.random.uniform(
        kw, (output_dim, input_dim), minval=-bound, maxval=bound, dtype=jnp.float32
    )
    bias = jax.random.uniform(
        kb, (output_dim,), minval=-bound, maxval=bound, dtype=jnp.float32
    )

    # Pallas path (forced; at this tiny size the default path takes the XLA bypass).
    y = linear_forward(x, weight, bias, force_pallas=True)
    jax.block_until_ready(y)
    y_ref = x @ weight.T + bias
    assert y.shape == (batch, output_dim)
    assert jnp.allclose(y, y_ref, atol=1e-5, rtol=1e-5)

    # Default path at the same size -> tiny-shape bypass, same numerics.
    y_bypass = linear_forward(x, weight, bias)
    jax.block_until_ready(y_bypass)
    assert jnp.allclose(y_bypass, y_ref, atol=1e-5, rtol=1e-5)

    # Tiled-path sanity check: D_in=4096 -> tk=2048 -> two K steps, exercising the
    # resident-output accumulation and bias seeding at k==0.
    B2, D_in2, D_out2 = 256, 4096, 384
    x2 = jax.random.normal(kx2, (B2, D_in2), dtype=jnp.float32)
    bound2 = 1.0 / (D_in2 ** 0.5)
    w2 = jax.random.uniform(
        kw2, (D_out2, D_in2), minval=-bound2, maxval=bound2, dtype=jnp.float32
    )
    b2 = jax.random.uniform(
        kb2, (D_out2,), minval=-bound2, maxval=bound2, dtype=jnp.float32
    )
    y2 = linear_forward(x2, w2, b2)
    jax.block_until_ready(y2)
    y2_ref = jnp.matmul(x2, w2.T, precision=jax.lax.Precision.HIGHEST) + b2
    assert y2.shape == (B2, D_out2)
    assert jnp.allclose(y2, y2_ref, atol=1e-3, rtol=1e-3)

    print("KERNEL_OK")
</pallas_src>

<mosaic_0001>
module attributes {stable_mosaic.version = 11 : i64} {
  func.func @_linear_kernel_f32_out(%arg0: i32, %arg1: i32, %arg2: i32, %arg3: memref<8x128xf32, #tpu.memory_space<vmem>>, %arg4: memref<128x128xf32, #tpu.memory_space<vmem>>, %arg5: memref<1x128xf32, #tpu.memory_space<vmem>>, %arg6: memref<8x128xf32, #tpu.memory_space<vmem>>) attributes {dimension_semantics = [#tpu.dimension_semantics<parallel>, #tpu.dimension_semantics<parallel>, #tpu.dimension_semantics<arbitrary>], iteration_bounds = array<i64: 1, 1, 1>, scalar_prefetch = 0 : i64, scratch_operands = 0 : i64, tpu.core_type = #tpu.core_type<tc>, window_params = [{transform_indices = @transform_0, window_bounds = array<i64: 8, 128>}, {transform_indices = @transform_1, window_bounds = array<i64: 128, 128>}, {transform_indices = @transform_2, window_bounds = array<i64: 1, 128>}, {transform_indices = @transform_3, window_bounds = array<i64: 8, 128>}]} {
    %c0_i32 = arith.constant 0 : i32
    %0 = arith.cmpi eq, %arg2, %c0_i32 : i32
    %1 = arith.extui %0 : i1 to i32
    %c0_i32_0 = arith.constant 0 : i32
    %2 = arith.cmpi ne, %1, %c0_i32_0 : i32
    scf.if %2 {
      %c0_8 = arith.constant 0 : index
      %c0_9 = arith.constant 0 : index
      %9 = vector.load %arg5[%c0_8, %c0_9] : memref<1x128xf32, #tpu.memory_space<vmem>>, vector<1x128xf32>
      %10 = vector.shape_cast %9 : vector<1x128xf32> to vector<1x128xf32>
      %11 = vector.broadcast %10 : vector<1x128xf32> to vector<8x128xf32>
      %c0_10 = arith.constant 0 : index
      %c0_11 = arith.constant 0 : index
      %12 = vector.load %arg6[%c0_10, %c0_11] : memref<8x128xf32, #tpu.memory_space<vmem>>, vector<8x128xf32>
      tpu.vector_store %arg6[%c0_10, %c0_11], %11 {strides = array<i32>} : memref<8x128xf32, #tpu.memory_space<vmem>>, vector<8x128xf32>,
    } else {
    }
    %c0 = arith.constant 0 : index
    %c0_1 = arith.constant 0 : index
    %3 = vector.load %arg6[%c0, %c0_1] : memref<8x128xf32, #tpu.memory_space<vmem>>, vector<8x128xf32>
    %c0_2 = arith.constant 0 : index
    %c0_3 = arith.constant 0 : index
    %4 = vector.load %arg3[%c0_2, %c0_3] : memref<8x128xf32, #tpu.memory_space<vmem>>, vector<8x128xf32>
    %c0_4 = arith.constant 0 : index
    %c0_5 = arith.constant 0 : index
    %5 = vector.load %arg4[%c0_4, %c0_5] : memref<128x128xf32, #tpu.memory_space<vmem>>, vector<128x128xf32>
    %cst = arith.constant dense<0.000000e+00> : vector<8x128xf32>
    %6 = tpu.matmul %4, %5, %cst {dimension_numbers = #tpu.dot_dimension_numbers<[1], [0], [0], [1], [0, 0, 1, 1], [], []>} : vector<8x128xf32>, vector<128x128xf32>, vector<8x128xf32> -> vector<8x128xf32>
    %7 = arith.addf %3, %6 : vector<8x128xf32>
    %c0_6 = arith.constant 0 : index
    %c0_7 = arith.constant 0 : index
    %8 = vector.load %arg6[%c0_6, %c0_7] : memref<8x128xf32, #tpu.memory_space<vmem>>, vector<8x128xf32>
    tpu.vector_store %arg6[%c0_6, %c0_7], %7 {strides = array<i32>} : memref<8x128xf32, #tpu.memory_space<vmem>>, vector<8x128xf32>,
    return
  }
  func.func @transform_0(%arg0: i32, %arg1: i32, %arg2: i32) -> (i32, i32) {
    %c0_i32 = arith.constant 0 : i32
    return %arg0, %arg2 : i32, i32
  }
  func.func @transform_1(%arg0: i32, %arg1: i32, %arg2: i32) -> (i32, i32) {
    %c0_i32 = arith.constant 0 : i32
    return %arg2, %arg1 : i32, i32
  }
  func.func @transform_2(%arg0: i32, %arg1: i32, %arg2: i32) -> (i32, i32) {
    %c0_i32 = arith.constant 0 : i32
    %c0_i32_0 = arith.constant 0 : i32
    return %c0_i32, %arg1 : i32, i32
  }
  func.func @transform_3(%arg0: i32, %arg1: i32, %arg2: i32) -> (i32, i32) {
    %c0_i32 = arith.constant 0 : i32
    return %arg0, %arg1 : i32, i32
  }
}

</mosaic_0001>

<bundles_post_ra>
// kernel: _linear_forward_impl.1
= control target key start
LH: loop header
LB: loop body
LE: loop exit
PB: predicated region body
PF: predicated region fallthrough
CT: control target
= control target key end

     0   :  { %v236_v3 = vmov 0.0|0.0   ;;  %vm237_vm0 = vmmov 0   ;;  %v238_v6 = vmov 0.0   ;;  %s326_s0 = inlined_call_operand.vmem [shape: f32[8,128], index: 0, kind: input, shape index: {}]   ;;  %s327_s1 = inlined_call_operand.vmem [shape: f32[128,128], index: 1, kind: input, shape index: {}]   ;;  %s328_s2 = inlined_call_operand.vmem [shape: f32[1,128], index: 2, kind: input, shape index: {}]   ;;  %s329_s3 = inlined_call_operand.hbm [shape: f32[8,128], index: 3, kind: output, shape index: {}]  }
   0x1   :  { %v29_v0 = vld [vmem:[%s327_s1] sm:$0xff]  ;;  %v30_v1 = vld [vmem:[%s327_s1 + $0x8] sm:$0xff]  ;;  %v31_v2 = vld [vmem:[%s327_s1 + $0x10] sm:$0xff]  ;;  %184 = vmatprep.subr.bf16.mxu0 %v236_v3  ;;  %181 = vmatprep.mubr.msk.f32.mxu0 %vm237_vm0, %v238_v6 }
   0x2   :  { %v185_v4 = vpack.c.bf16 %v30_v1, %v29_v0  ;;  %v32_v5 = vld [vmem:[%s327_s1 + $0x18] sm:$0xff]  ;;  %v33_v8 = vld [vmem:[%s327_s1 + $0x20] sm:$0xff]  ;;  %v34_v9 = vld [vmem:[%s327_s1 + $0x28] sm:$0xff] }
   0x3   :  { %v188_v7 = vpack.c.bf16 %v32_v5, %v31_v2 }
   0x4   :  { %186 = vmatpush3.bf16.msra.mxu0 %v185_v4 }
   0x5   :  { %187 = vmatprep.subr.bf16.mxu0 %v236_v3 }
   0x6   :  { %8 = vsyncpa [#allocation3], 0  ;;  %v191_v10 = vpack.c.bf16 %v34_v9, %v33_v8  ;;  %v35_v11 = vld [vmem:[%s327_s1 + $0x30] sm:$0xff]  ;;  %v36_v12 = vld [vmem:[%s327_s1 + $0x38] sm:$0xff]  ;;  %s239_s21 = smov [#allocation2]  }
   0x7   :  { %v194_v13 = vpack.c.bf16 %v36_v12, %v35_v11  ;;  %v37_v14 = vld [vmem:[%s327_s1 + $0x40] sm:$0xff]  ;;  %v38_v15 = vld [vmem:[%s327_s1 + $0x48] sm:$0xff]  ;;  %v39_v17 = vld [vmem:[%s327_s1 + $0x50] sm:$0xff]  ;;  %s123_s22 = sshll.u32 %s239_s21, 4  ;;  %s124_s22 = int_to_ptr.vmem [resolvable:$true] %s123_s22 }
   0x8   :  { %189 = vmatpush3.bf16.msra.mxu0 %v188_v7  ;;  %v197_v16 = vpack.c.bf16 %v38_v15, %v37_v14  ;;  %v40_v18 = vld [vmem:[%s327_s1 + $0x58] sm:$0xff]  ;;  %v41_v20 = vld [vmem:[%s327_s1 + $0x60] sm:$0xff]  ;;  %v42_v21 = vld [vmem:[%s327_s1 + $0x68] sm:$0xff]  ;;  %p217_p1 = scmp.lt.s32.totalorder %s124_s22, %s124_s22 }
   0x9   :  { %190 = vmatprep.subr.bf16.mxu0 %v236_v3  ;;  %v200_v19 = vpack.c.bf16 %v40_v18, %v39_v17  ;;  %v203_v22 = vpack.c.bf16 %v42_v21, %v41_v20  ;;  %v43_v23 = vld [vmem:[%s327_s1 + $0x70] sm:$0xff]  ;;  %v44_v24 = vld [vmem:[%s327_s1 + $0x78] sm:$0xff]  ;;  %v28_v26 = vld [vmem:[%s326_s0] sm:$0xff]  ;;  %s212_s1 = scalar_lea.vmem %s124_s22, 128 }
   0xa   :  { %v206_v25 = vpack.c.bf16 %v44_v24, %v43_v23  ;;  %v131_v27 = vld [vmem:[%s328_s2] ss:$0 sm:$0xff]  ;;  %p213_p0 = scmp.ne.s32.totalorder %s124_s22, %s212_s1  ;;  %p218_p2 = scmp.lt.s32.totalorder %s212_s1, %s212_s1 }
   0xc   :  { %192 = vmatpush3.bf16.msra.mxu0 %v191_v10  ;;  %p219_p3 = por %p218_p2, %p217_p1 }
   0xd   :  { %193 = vmatprep.subr.bf16.mxu0 %v236_v3 }
   0xe   :  { %p220_p4 = pnand %p219_p3, %p213_p0 }
  0x10   :  { %195 = vmatpush3.bf16.msra.mxu0 %v194_v13 }
  0x11   :  { %196 = vmatprep.subr.bf16.mxu0 %v236_v3 }
  0x14   :  { %198 = vmatpush3.bf16.msra.mxu0 %v197_v16 }
  0x15   :  { %199 = vmatprep.subr.bf16.mxu0 %v236_v3 }
  0x18   :  { %201 = vmatpush3.bf16.msra.mxu0 %v200_v19 }
  0x19   :  { %202 = vmatprep.subr.bf16.mxu0 %v236_v3 }
  0x1c   :  { %204 = vmatpush3.bf16.msra.mxu0 %v203_v22 }
  0x1d   :  { %205 = vmatprep.subr.bf16.mxu0 %v236_v3 }
  0x20   :  { %207 = vmatpush3.bf16.msra.mxu0 %v206_v25 }
  0x23   :  { %182 = vmatmul.mubr.f32.vlgmr.msra.gmra.mrb[0].mxu0 %v28_v26 }
  0xf6   :  { %v111_v28 = vpop.f32.mrb[0].mxu0 }
  0xf7   :  { %v115_v29 = vadd.f32 %v131_v27, %v111_v28  ;;  %v183_v30 = vpop.f32.mrb[1].mxu0 }
  0xf9   :  { %116 = vst [vmem:[#allocation2] sm:$0xff] %v115_v29 }
  0xfa   :  { %223 = shalt.err (!%p220_p4)
}
  0xfb   :  { %s224_s24 = scalar_lea.hbm %s329_s3, 128 }
  0xfc   :  { %p225_p5 = scmp.ne.s32.totalorder %s329_s3, %s224_s24  ;;  %p228_p6 = scmp.lt.u32.totalorder %s224_s24, %s329_s3 }
  0xfe   :  { %p230_p7 = pnand %p228_p6, %p225_p5 }
 0x100   :  { %233 = shalt.err (!%p230_p7)
}
 0x101   :  { %126 = dma.vmem_to_hbm [thread:$0]  %s124_s22, 128, %s329_s3, [#allocation3]  }
 0x102   :  { %234 = dma.done.wait [#allocation3], 128  }
 0x103   :  { %235 = vsyncadd [#allocation3], 4294967168 }
 0x104   :  { %130 = vsyncpa [#allocation3], 1 }

</bundles_post_ra>
